<compile_context>
chip_gen: v7x
topology: tpu7x:2x2x1
jax: 0.10.0
libtpu: 0.0.40
codegen_flags: <defaults>
</compile_context>

<pallas_src>
import functools

import jax
import jax.numpy as jnp
from jax import lax
from jax.experimental import pallas as pl
from jax.experimental.pallas import tpu as pltpu


def compute_same_pad(kernel_size, stride):
    if isinstance(kernel_size, int):
        kernel_size = [kernel_size]
    if isinstance(stride, int):
        stride = [stride]
    assert len(stride) == len(kernel_size)
    return [((k - 1) * s + 1) // 2 for k, s in zip(kernel_size, stride)]


def _round_up(x, m):
    return ((x + m - 1) // m) * m


def _conv2d_zeros_kernel(x_ref, w_ref, b_ref, o_ref, slab_ref, *,
                         n_taps, c_in, wp, kw, t_l, t_win):
    # x_ref   : (c_in, L_in)        compute-dtype, batch-merged padded image, resident.
    # w_ref   : (c_out, n_taps*c_in) compute-dtype im2col weights (exp(logs*lsf) folded).
    # b_ref   : (c_out, 1)          f32 scaled bias.
    # o_ref   : (c_out, t_l)        f32 lane-dense output tile.
    # slab_ref: (n_taps*c_in, t_l)  compute-dtype scratch im2col slab.
    j = pl.program_id(0)
    base = pl.multiple_of(j * t_l, 128)            # t_l is a multiple of 128

    # One aligned load of the superset window; all tap shifts are derived in-register
    # (XLU lane shifts) instead of 9 unaligned VMEM loads.
    win = x_ref[:, pl.ds(base, t_win)]             # (c_in, t_win)

    # Build the (K, t_l) im2col slab: n_taps sublane-offset stores (offsets are
    # multiples of c_in, so packed-word aligned for bf16 as well).
    for k in range(n_taps):                        # fully unrolled (9 taps for 3x3)
        ky, kx = divmod(k, kw)
        off = ky * wp + kx                         # static lane shift
        slab_ref[pl.ds(k * c_in, c_in), :] = win[:, off:off + t_l]

    # Single MXU matmul with K = n_taps*c_in (instead of 9 tiny K=c_in dots).
    acc = jnp.dot(w_ref[...], slab_ref[...], preferred_element_type=jnp.float32)
    o_ref[...] = (acc + b_ref[...]).astype(o_ref.dtype)


def conv2d_zeros_forward(x, weight, bias, logs, logscale_factor=3,
                         compute_dtype=jnp.bfloat16):
    """Pallas TPU implementation of Conv2dZeros.forward (stride 1, 'same' padding).

    x: (N, C_in, H, W), weight: (C_out, C_in, kh, kw), bias: (C_out,), logs: (C_out,1,1).
    Returns (N, C_out, H, W).
    """
    n, c_in, h, w = x.shape
    c_out, c_in_w, kh, kw = weight.shape
    assert c_in == c_in_w
    assert kh % 2 == 1 and kw % 2 == 1, "odd kernel sizes only"
    ph, pw = compute_same_pad((kh, kw), (1, 1))
    # TODO(synk): stride > 1 and padding='valid' branches of Conv2dZeros are not implemented.

    n_taps = kh * kw
    k_dim = n_taps * c_in

    # Fold the per-channel output scale exp(logs * logscale_factor) into weight & bias.
    scale = jnp.exp(logs.reshape(c_out).astype(jnp.float32) * logscale_factor)   # (C_out,)
    w_eff = weight.astype(jnp.float32) * scale[:, None, None, None]
    b_eff = (bias.astype(jnp.float32) * scale).reshape(c_out, 1)                  # f32
    # im2col weight matrix; column index = (ky*kw + kx)*c_in + c.
    w_mat = jnp.transpose(w_eff, (0, 2, 3, 1)).reshape(c_out, k_dim).astype(compute_dtype)

    # Spatially pad, flatten (H,W), and merge the batch dim into one long lane axis.
    hp, wp = h + 2 * ph, w + 2 * pw
    seg = hp * wp                                   # per-batch flat segment length
    off_max = (kh - 1) * wp + (kw - 1)              # largest tap offset

    l_out = (n - 1) * seg + h * wp                  # last valid output flat index + 1
    t_cap = 2048                                    # lane-dense tile cap (vreg-pressure safe)
    n_tiles = max(2 if l_out > 128 else 1,          # >=2 parallel steps for v7x's 2 TCs
                  pl.cdiv(l_out, t_cap))
    t_l = _round_up(pl.cdiv(l_out, n_tiles), 128)
    n_tiles = pl.cdiv(l_out, t_l)
    halo = _round_up(off_max, 128)                  # aligned halo for the window load
    t_win = t_l + halo
    l_in = max(n_tiles * t_l + halo, n * seg)       # all in-kernel reads stay in bounds

    xp = jnp.pad(x, ((0, 0), (0, 0), (ph, ph), (pw, pw)))          # (n, c_in, hp, wp)
    xf = jnp.transpose(xp.reshape(n, c_in, seg), (1, 0, 2)).reshape(c_in, n * seg)
    xf = jnp.pad(xf, ((0, 0), (0, l_in - n * seg))).astype(compute_dtype)

    kernel = functools.partial(_conv2d_zeros_kernel, n_taps=n_taps, c_in=c_in,
                               wp=wp, kw=kw, t_l=t_l, t_win=t_win)

    flops = 2 * c_out * k_dim * n_tiles * t_l
    bytes_accessed = (xf.size * xf.dtype.itemsize
                      + w_mat.size * w_mat.dtype.itemsize
                      + b_eff.size * 4
                      + c_out * n_tiles * t_l * 4)

    out_flat = pl.pallas_call(
        kernel,
        out_shape=jax.ShapeDtypeStruct((c_out, n_tiles * t_l), jnp.float32),
        grid_spec=pltpu.PrefetchScalarGridSpec(
            num_scalar_prefetch=0,
            grid=(n_tiles,),
            in_specs=[
                pl.BlockSpec((c_in, l_in), lambda j: (0, 0)),     # resident input
                pl.BlockSpec((c_out, k_dim), lambda j: (0, 0)),   # resident weights
                pl.BlockSpec((c_out, 1), lambda j: (0, 0)),       # resident bias
            ],
            out_specs=pl.BlockSpec((c_out, t_l), lambda j: (0, j)),
            scratch_shapes=[pltpu.VMEM((k_dim, t_l), compute_dtype)],
        ),
        compiler_params=pltpu.CompilerParams(
            dimension_semantics=("parallel",),
            allow_input_fusion=[True, True, True],
            vmem_limit_bytes=32 * 1024 * 1024,
        ),
        cost_estimate=pl.CostEstimate(flops=flops, transcendentals=0,
                                      bytes_accessed=bytes_accessed),
    )(xf, w_mat, b_eff)

    # Crop padded rows/columns and un-merge the batch axis (one fused slice/reshape copy).
    total = n * seg
    if out_flat.shape[1] >= total:
        of = out_flat[:, :total]
    else:
        of = jnp.pad(out_flat, ((0, 0), (0, total - out_flat.shape[1])))
    out = of.reshape(c_out, n, hp, wp)[:, :, :h, :w].transpose(1, 0, 2, 3)
    return out.astype(x.dtype)


if __name__ == "__main__":
    key = jax.random.PRNGKey(0)
    k_w, k_b, k_l, k_x = jax.random.split(key, 4)

    n, c_in, h, w = 2, 4, 16, 16
    c_out = 8
    logscale_factor = 3

    x = jax.random.normal(k_x, (n, c_in, h, w), dtype=jnp.float32)

    # 1) Faithful Conv2dZeros initialization: zero weight/bias/logs -> output is all zeros.
    w0 = jnp.zeros((c_out, c_in, 3, 3), jnp.float32)
    b0 = jnp.zeros((c_out,), jnp.float32)
    logs0 = jnp.zeros((c_out, 1, 1), jnp.float32)
    z0 = jax.block_until_ready(conv2d_zeros_forward(x, w0, b0, logs0, logscale_factor))
    assert z0.shape == (n, c_out, h, w)
    assert jnp.allclose(z0, 0.0)

    # 2) Non-trivial parameters vs a plain-JAX f32 conv reference.
    wgt = 0.1 * jax.random.normal(k_w, (c_out, c_in, 3, 3), dtype=jnp.float32)
    bias = 0.1 * jax.random.normal(k_b, (c_out,), dtype=jnp.float32)
    logs = 0.1 * jax.random.normal(k_l, (c_out, 1, 1), dtype=jnp.float32)

    z_conv = lax.conv_general_dilated(
        x, wgt, window_strides=(1, 1), padding=((1, 1), (1, 1)),
        dimension_numbers=("NCHW", "OIHW", "NCHW"),
    ) + bias[None, :, None, None]
    z_ref = z_conv * jnp.exp(logs * logscale_factor)[None]

    # Default (bf16 MXU operands, f32 accumulate) path: loose tolerance for bf16 rounding.
    z = jax.block_until_ready(conv2d_zeros_forward(x, wgt, bias, logs, logscale_factor))
    assert z.shape == z_ref.shape
    assert jnp.allclose(z, z_ref, atol=3e-2, rtol=3e-2), float(jnp.abs(z - z_ref).max())

    # Full-f32 path: tight tolerance (validates the im2col/shift math exactly).
    z32 = jax.block_until_ready(conv2d_zeros_forward(
        x, wgt, bias, logs, logscale_factor, compute_dtype=jnp.float32))
    assert jnp.allclose(z32, z_ref, atol=1e-4, rtol=1e-4), float(jnp.abs(z32 - z_ref).max())

    print("KERNEL_OK")
</pallas_src>

<mosaic_0001>
module attributes {stable_mosaic.version = 11 : i64} {
  func.func @_conv2d_zeros_kernel(%arg0: i32, %arg1: memref<4x896xbf16, #tpu.memory_space<vmem>>, %arg2: memref<8x36xbf16, #tpu.memory_space<vmem>>, %arg3: memref<8x1xf32, #tpu.memory_space<vmem>>, %arg4: memref<8x384xf32, #tpu.memory_space<vmem>>, %arg5: memref<36x384xbf16, #tpu.memory_space<vmem>>) attributes {dimension_semantics = [#tpu.dimension_semantics<parallel>], iteration_bounds = array<i64: 2>, scalar_prefetch = 0 : i64, scratch_operands = 1 : i64, tpu.core_type = #tpu.core_type<tc>, window_params = [{pipeline_mode = #tpu.pipeline_mode<synchronous>, transform_indices = @transform_0, window_bounds = array<i64: 4, 896>}, {pipeline_mode = #tpu.pipeline_mode<synchronous>, transform_indices = @transform_1, window_bounds = array<i64: 8, 36>}, {pipeline_mode = #tpu.pipeline_mode<synchronous>, transform_indices = @transform_2, window_bounds = array<i64: 8, 1>}, {transform_indices = @transform_3, window_bounds = array<i64: 8, 384>}]} {
    %c384_i32 = arith.constant 384 : i32
    %0 = arith.muli %arg0, %c384_i32 : i32
    %1 = tpu.assume_multiple %0, 128 : i32
    %c0 = arith.constant 0 : index
    %2 = arith.index_cast %1 : i32 to index
    %3 = vector.load %arg1[%c0, %2] : memref<4x896xbf16, #tpu.memory_space<vmem>>, vector<4x512xbf16>
    %4 = vector.extract_strided_slice %3 {offsets = [0, 0], sizes = [4, 384], strides = [1, 1]} : vector<4x512xbf16> to vector<4x384xbf16>
    %c0_0 = arith.constant 0 : index
    %c0_1 = arith.constant 0 : index
    %5 = vector.load %arg5[%c0_0, %c0_1] : memref<36x384xbf16, #tpu.memory_space<vmem>>, vector<4x384xbf16>
    tpu.vector_store %arg5[%c0_0, %c0_1], %4 {strides = array<i32>} : memref<36x384xbf16, #tpu.memory_space<vmem>>, vector<4x384xbf16>,
    %6 = vector.extract_strided_slice %3 {offsets = [0, 1], sizes = [4, 384], strides = [1, 1]} : vector<4x512xbf16> to vector<4x384xbf16>
    %c4 = arith.constant 4 : index
    %c0_2 = arith.constant 0 : index
    %7 = vector.load %arg5[%c4, %c0_2] : memref<36x384xbf16, #tpu.memory_space<vmem>>, vector<4x384xbf16>
    tpu.vector_store %arg5[%c4, %c0_2], %6 {strides = array<i32>} : memref<36x384xbf16, #tpu.memory_space<vmem>>, vector<4x384xbf16>,
    %8 = vector.extract_strided_slice %3 {offsets = [0, 2], sizes = [4, 384], strides = [1, 1]} : vector<4x512xbf16> to vector<4x384xbf16>
    %c8 = arith.constant 8 : index
    %c0_3 = arith.constant 0 : index
    %9 = vector.load %arg5[%c8, %c0_3] : memref<36x384xbf16, #tpu.memory_space<vmem>>, vector<4x384xbf16>
    tpu.vector_store %arg5[%c8, %c0_3], %8 {strides = array<i32>} : memref<36x384xbf16, #tpu.memory_space<vmem>>, vector<4x384xbf16>,
    %10 = vector.extract_strided_slice %3 {offsets = [0, 18], sizes = [4, 384], strides = [1, 1]} : vector<4x512xbf16> to vector<4x384xbf16>
    %c12 = arith.constant 12 : index
    %c0_4 = arith.constant 0 : index
    %11 = vector.load %arg5[%c12, %c0_4] : memref<36x384xbf16, #tpu.memory_space<vmem>>, vector<4x384xbf16>
    tpu.vector_store %arg5[%c12, %c0_4], %10 {strides = array<i32>} : memref<36x384xbf16, #tpu.memory_space<vmem>>, vector<4x384xbf16>,
    %12 = vector.extract_strided_slice %3 {offsets = [0, 19], sizes = [4, 384], strides = [1, 1]} : vector<4x512xbf16> to vector<4x384xbf16>
    %c16 = arith.constant 16 : index
    %c0_5 = arith.constant 0 : index
    %13 = vector.load %arg5[%c16, %c0_5] : memref<36x384xbf16, #tpu.memory_space<vmem>>, vector<4x384xbf16>
    tpu.vector_store %arg5[%c16, %c0_5], %12 {strides = array<i32>} : memref<36x384xbf16, #tpu.memory_space<vmem>>, vector<4x384xbf16>,
    %14 = vector.extract_strided_slice %3 {offsets = [0, 20], sizes = [4, 384], strides = [1, 1]} : vector<4x512xbf16> to vector<4x384xbf16>
    %c20 = arith.constant 20 : index
    %c0_6 = arith.constant 0 : index
    %15 = vector.load %arg5[%c20, %c0_6] : memref<36x384xbf16, #tpu.memory_space<vmem>>, vector<4x384xbf16>
    tpu.vector_store %arg5[%c20, %c0_6], %14 {strides = array<i32>} : memref<36x384xbf16, #tpu.memory_space<vmem>>, vector<4x384xbf16>,
    %16 = vector.extract_strided_slice %3 {offsets = [0, 36], sizes = [4, 384], strides = [1, 1]} : vector<4x512xbf16> to vector<4x384xbf16>
    %c24 = arith.constant 24 : index
    %c0_7 = arith.constant 0 : index
    %17 = vector.load %arg5[%c24, %c0_7] : memref<36x384xbf16, #tpu.memory_space<vmem>>, vector<4x384xbf16>
    tpu.vector_store %arg5[%c24, %c0_7], %16 {strides = array<i32>} : memref<36x384xbf16, #tpu.memory_space<vmem>>, vector<4x384xbf16>,
    %18 = vector.extract_strided_slice %3 {offsets = [0, 37], sizes = [4, 384], strides = [1, 1]} : vector<4x512xbf16> to vector<4x384xbf16>
    %c28 = arith.constant 28 : index
    %c0_8 = arith.constant 0 : index
    %19 = vector.load %arg5[%c28, %c0_8] : memref<36x384xbf16, #tpu.memory_space<vmem>>, vector<4x384xbf16>
    tpu.vector_store %arg5[%c28, %c0_8], %18 {strides = array<i32>} : memref<36x384xbf16, #tpu.memory_space<vmem>>, vector<4x384xbf16>,
    %20 = vector.extract_strided_slice %3 {offsets = [0, 38], sizes = [4, 384], strides = [1, 1]} : vector<4x512xbf16> to vector<4x384xbf16>
    %c32 = arith.constant 32 : index
    %c0_9 = arith.constant 0 : index
    %21 = vector.load %arg5[%c32, %c0_9] : memref<36x384xbf16, #tpu.memory_space<vmem>>, vector<4x384xbf16>
    tpu.vector_store %arg5[%c32, %c0_9], %20 {strides = array<i32>} : memref<36x384xbf16, #tpu.memory_space<vmem>>, vector<4x384xbf16>,
    %c0_10 = arith.constant 0 : index
    %c0_11 = arith.constant 0 : index
    %22 = vector.load %arg2[%c0_10, %c0_11] : memref<8x36xbf16, #tpu.memory_space<vmem>>, vector<8x36xbf16>
    %c0_12 = arith.constant 0 : index
    %c0_13 = arith.constant 0 : index
    %23 = vector.load %arg5[%c0_12, %c0_13] : memref<36x384xbf16, #tpu.memory_space<vmem>>, vector<36x384xbf16>
    %cst = arith.constant dense<0.000000e+00> : vector<8x384xf32>
    %24 = tpu.matmul %22, %23, %cst {dimension_numbers = #tpu.dot_dimension_numbers<[1], [0], [0], [1], [0, 0, 1, 1], [], []>} : vector<8x36xbf16>, vector<36x384xbf16>, vector<8x384xf32> -> vector<8x384xf32>
    %c0_14 = arith.constant 0 : index
    %c0_15 = arith.constant 0 : index
    %25 = vector.load %arg3[%c0_14, %c0_15] : memref<8x1xf32, #tpu.memory_space<vmem>>, vector<8x1xf32>
    %26 = vector.broadcast %25 : vector<8x1xf32> to vector<8x384xf32>
    %27 = arith.addf %24, %26 : vector<8x384xf32>
    %c0_16 = arith.constant 0 : index
    %c0_17 = arith.constant 0 : index
    %28 = vector.load %arg4[%c0_16, %c0_17] : memref<8x384xf32, #tpu.memory_space<vmem>>, vector<8x384xf32>
    tpu.vector_store %arg4[%c0_16, %c0_17], %27 {strides = array<i32>} : memref<8x384xf32, #tpu.memory_space<vmem>>, vector<8x384xf32>,
    return
  }
  func.func @transform_0(%arg0: i32) -> (i32, i32) {
    %c0_i32 = arith.constant 0 : i32
    %c0_i32_0 = arith.constant 0 : i32
    %c0_i32_1 = arith.constant 0 : i32
    return %c0_i32, %c0_i32_0 : i32, i32
  }
  func.func @transform_1(%arg0: i32) -> (i32, i32) {
    %c0_i32 = arith.constant 0 : i32
    %c0_i32_0 = arith.constant 0 : i32
    %c0_i32_1 = arith.constant 0 : i32
    return %c0_i32, %c0_i32_0 : i32, i32
  }
  func.func @transform_2(%arg0: i32) -> (i32, i32) {
    %c0_i32 = arith.constant 0 : i32
    %c0_i32_0 = arith.constant 0 : i32
    %c0_i32_1 = arith.constant 0 : i32
    return %c0_i32, %c0_i32_0 : i32, i32
  }
  func.func @transform_3(%arg0: i32) -> (i32, i32) {
    %c0_i32 = arith.constant 0 : i32
    %c0_i32_0 = arith.constant 0 : i32
    return %c0_i32, %arg0 : i32, i32
  }
}

</mosaic_0001>

<bundles_post_ra>
// kernel: tpu_custom_call.1
= control target key start
LH: loop header
LB: loop body
LE: loop exit
PB: predicated region body
PF: predicated region fallthrough
CT: control target
= control target key end

     0   :  { %8 = vsyncpa [#allocation4], 0  ;;  %s941_s0 = inlined_call_operand.hbm [shape: bf16[4,896], index: 0, kind: input, shape index: {}]   ;;  %s942_s1 = inlined_call_operand.vmem [shape: bf16[8,36], index: 1, kind: input, shape index: {}]   ;;  %s943_s2 = inlined_call_operand.vmem [shape: f32[8,1], index: 2, kind: input, shape index: {}]   ;;  %s944_s3 = inlined_call_operand.hbm [shape: f32[8,768], index: 3, kind: output, shape index: {}]  }
   0x1   :  { %9 = vsyncpa [#allocation5], 0 }
   0x2   :  { %11 = vsyncpa [#allocation5 + $0x1], 0  ;;  %s785_s12 = smov 0   ;;  %s787_s13 = smov 0  }
   0x3   :  { %s789_s14 = smov 0   ;;  %s791_s15 = smov 0  }
   0x4 LB: > { %s806_s16 = sadd.s32 4294967295, %s749_s15   ;;  %s542_s17 = sadd.s32 4294967294, %s749_s15   ;;  %s749_s15 = sphi %s791_s15, %s960_s15   ;;  %s745_s14 = sphi %s789_s14, %s959_s14   ;;  %s741_s13 = sphi %s787_s13, %s958_s13   ;;  %s737_s12 = sphi %s785_s12, %s957_s12  }
   0x5   : > { %s810_s18 = sadd.s32 1, %s749_s15   ;;  %s87_s19 = sadd.s32 1, %s745_s14 }
   0x6   : > { %s84_s20 = ssub.s32 %s749_s15, %s810_s18  ;;  %p97_p0 = scmp.ne.s32.totalorder %s745_s14, %s741_s13 }
   0x7   : > { %p85_p1 = scmp.eq.s32.totalorder %s84_s20, 0  ;;  %p98_p2 = scmp.eq.s32.totalorder %s806_s16, 1 }
   0x8   : > { %p103_p3 = scmp.ne.s32.totalorder %s741_s13, %s737_s12  ;;  %p104_p4 = scmp.eq.s32.totalorder %s542_s17, 1 }
   0x9   : > { %s821_s21 = scalar_select %p85_p1, %s745_s14, %s87_s19  }
   0xa   : > { %p823_p5 = por %p98_p2, %p97_p0  ;;  %p827_p6 = por %p104_p4, %p103_p3 }
   0xb   : > { %p543_p7 = scmp.ge.s32.totalorder %s749_s15, 1  ;;  %p111_p8 = scmp.lt.s32.totalorder %s749_s15, 3 }
   0xc   : > { %s948_s22 = scalar_select %p823_p5, 1, 0 }
   0xd   : > { %s949_s23 = scalar_select %p827_p6, 1, 0 }
   0xe   : > { %p945_p9 = scmp.eq.s32.totalorder %s806_s16, 0  ;;  %p834_p10 = pnand %p543_p7, %p111_p8 }
   0xf   : > { %s751_s25 = smov [#allocation3]   ;;  %s655_s30 = scalar_lea.hbm %s941_s0, 224 }
  0x10   : > { %s950_s24 = scalar_select %p834_p10, 1, 0 }
  0x11   : > { %s124_s26 = sshll.u32 %s751_s25, 4  ;;  %p587_p11 = pneg %p834_p10  ;;  %s125_s26 = int_to_ptr.vmem [resolvable:$true] %s124_s26 }
  0x12   : > { %p656_p13 = scmp.ne.s32.totalorder %s941_s0, %s655_s30  ;;  %p662_p3 = scmp.lt.u32.totalorder %s655_s30, %s941_s0 }
  0x13   : > { %p842_p12 = pnand %p945_p9, %p587_p11 }
  0x15   : > { %p657_p0 = pneg %p842_p12 }
  0x17   : > { %p658_p1 = pnand %p657_p0, %p656_p13 }
  0x19   : > { %p659_p2 = pneg %p658_p1 }
  0x1b   : > { %p664_p4 = pnand %p662_p3, %p659_p2 }
  0x1d   : > { %667 = shalt.err (!%p664_p4)
}
  0x1e   : > { %s668_s8 = scalar_lea.vmem %s125_s26, 224  ;;  %p676_p9 = scmp.lt.s32.totalorder %s125_s26, %s125_s26 }
  0x1f   : > { %p669_p7 = scmp.ne.s32.totalorder %s125_s26, %s668_s8  ;;  %p677_p6 = scmp.lt.s32.totalorder %s668_s8, %s668_s8 }
  0x21   : > { %p671_p8 = pnand %p669_p7, %p657_p0  ;;  %p678_p5 = por %p677_p6, %p676_p9 }
  0x23   : > { %p672_p11 = pneg %p671_p8 }
  0x25   : > { %p679_p10 = pnand %p678_p5, %p672_p11 }
  0x27   : > { %682 = shalt.err (!%p679_p10)
}
  0x28   : > { %590 = dma.hbm_to_vmem [thread:$0]  (!%p842_p12), %s941_s0, 224, %s125_s26, [#allocation4]  }
  0x29   : > { %p952_p13 = scmp.ne.s32.totalorder %s950_s24, 0 }
  0x2a   : > { %p953_p1 = scmp.eq.s32.totalorder (!%p952_p13), %s806_s16, 0 }
  0x2b   : > { %143 = sbr.rel (%p952_p13) target bundleno = 450 (0x1c2), region = 32 }
  0x32   : > { %728 = dma.done.wait (%p953_p1), [#allocation4], 224   ;;  %p954_p0 = pmov %p953_p1 }
  0x33   : > { %s164_s11 = smul.u32 384, %s806_s16  ;;  %v175_v0 = vlaneseq  ;;  %v752_v1 = vmov 1983009808   ;;  %s753_s24 = smov 126   ;;  %v757_v12 = vmov 0.0   ;;  %vm762_vm0 = vmmov 0  }
  0x34   : > { %730 = vsyncadd (%p954_p0), [#allocation4], 4294967072  ;;  %v173_v2 = vunpack.c.l.s4 %v752_v1  ;;  %s754_s25 = smov 127   ;;  %s755_s26 = smov 110   ;;  %570 = vmatprep.subr.bf16.mxu1 %v757_v12  ;;  %576 = vmatprep.mubr.msk.bf16.mxu1 %vm762_vm0, %v757_v12  ;;  %v763_v13 = vmov 0   ;;  %v322_v14 = vld [vmem:[%s943_s2] sm:$0xff] }
  0x35   : > { %s165_s17 = sshra.s32 %s164_s11, 7  ;;  %v176_v3 = vshrl.u32 %v175_v0, 7  ;;  %s756_s27 = smov 109   ;;  %414 = vmatprep.mubr.bf16.mxu0 %v763_v13  ;;  %643 = vset.pattern.permute.xlu0 %v763_v13  ;;  %vm206_vm1 = vcmask 1039360   ;;  %vm234_vm2 = vcmask 900096   ;;  %vm204_vm3 = vcmask 1043456  }
  0x36   : > { %s547_s19 = sshll.u32 %s165_s17, 1  ;;  %v174_v4 = vunpack.c.0.s8 %v173_v2  ;;  %s758_s28 = smov 108   ;;  %vm220_vm4 = vcmask 1031168   ;;  %vm248_vm5 = vcmask 891904   ;;  %vm262_vm6 = vcmask 883712  }
  0x37   : > { %s168_s20 = scalar_lea.vmem [#allocation3], %s547_s19  ;;  %s759_s29 = smov 92   ;;  %vm276_vm7 = vcmask 752640   ;;  %vm290_vm8 = vcmask 744448   ;;  %vm304_vm9 = vcmask 736256   ;;  %vm372_vm10 = vcmask 1041408  }
  0x38   : > { %v177_v5 = vsub.s32 %v174_v4, %v176_v3  ;;  %v169_v6 = vld [vmem:[%s168_s20] sm:$0xff]  ;;  %s760_s30 = smov 91   ;;  %s761_s4 = smov 90   ;;  %vm368_vm11 = vcmask 293888  }
  0x39   : > { %548 = vst.sshfl [vmem:[#allocation2] sm:$0xf pattern:$0x76325410] %v169_v6  ;;  %v171_v8 = vcombine.high %v169_v6, %v169_v6  ;;  %v190_v9 = vcombine.low %v169_v6, %v169_v6  ;;  %s159_s9 = sand.u32 1, %s741_s13   ;;  %p955_p6 = scmp.ne.s32.totalorder %s948_s22, 0 }
  0x3a   : > { %v178_v7 = vrot.slane %v169_v6, %v177_v5  ;;  %s580_s10 = smul.u32 24, %s159_s9  ;;  %s764_s16 = smov [#allocation6]  }
  0x3b   : > { %549 = vst.sshfl [vmem:[#allocation2 + $0x8] sm:$0x3 pattern:$0x76325410] %v171_v8  ;;  %v197_v10 = vrot.slane %v190_v9, %v177_v5  ;;  %v185_v11 = vrot.slane %v171_v8, %v177_v5 }
  0x3c   : > { %213 = vrot.lane.b32.xlu1 %v178_v7, %s753_s24  ;;  %200 = vrot.lane.b32.xlu0 %v178_v7, %s754_s25  ;;  %s161_s17 = scalar_lea.vmem [#allocation6], %s580_s10 }
  0x3d   : > { %s481_s19 = sshll.u32 %s161_s17, 4  ;;  %s901_s19 = int_to_ptr.vmem [resolvable:$true] %s481_s19 }
  0x40   : > { %229 = vrot.lane.b32.xlu1 %v178_v7, %s755_s26  ;;  %241 = vrot.lane.b32.xlu0 %v178_v7, %s756_s27 }
  0x44   : > { %198 = vrot.lane.b32.xlu0 %v197_v10, %s754_s25  ;;  %215 = vrot.lane.b32.xlu1 %v185_v11, %s753_s24  ;;  %s899_s25 = scalar_lea.hbm %s944_s3, %s164_s11 }
  0x48   : > { %227 = vrot.lane.b32.xlu0 %v197_v10, %s755_s26  ;;  %243 = vrot.lane.b32.xlu1 %v185_v11, %s756_s27  ;;  %s467_s26 = scalar_lea.sflag [#allocation5], %s159_s9  ;;  %s683_s27 = scalar_lea.vmem %s901_s19, 384 }
  0x49   : > { %p684_p5 = scmp.ne.s32.totalorder %s901_s19, %s683_s27 }
  0x4b   : > { %p685_p9 = pnand %p684_p5, %p955_p6 }
  0x4c   : > { %255 = vrot.lane.b32.xlu0 %v197_v10, %s758_s28  ;;  %257 = vrot.lane.b32.xlu1 %v178_v7, %s758_s28  ;;  %s687_s28 = sshll.u32 %s764_s16, 4  ;;  %s688_s28 = int_to_ptr.vmem [resolvable:$false] %s687_s28 }
  0x4d   : > { %p686_p10 = pneg %p685_p9  ;;  %p690_p12 = scmp.lt.s32.totalorder %s901_s19, %s688_s28 }
  0x50   : > { %269 = vrot.lane.b32.xlu0 %v178_v7, %s759_s29  ;;  %271 = vrot.lane.b32.xlu1 %v185_v11, %s759_s29  ;;  %s689_s29 = scalar_lea.vmem %s688_s28, 768 }
  0x51   : > { %p691_p2 = scmp.lt.s32.totalorder %s689_s29, %s683_s27 }
  0x53   : > { %p692_p3 = por %p691_p2, %p690_p12 }
  0x54   : > { %283 = vrot.lane.b32.xlu0 %v197_v10, %s760_s30  ;;  %285 = vrot.lane.b32.xlu1 %v178_v7, %s760_s30 }
  0x55   : > { %p693_p4 = pnand %p692_p3, %p686_p10 }
  0x58   : > { %297 = vrot.lane.b32.xlu0 %v178_v7, %s761_s4  ;;  %299 = vrot.lane.b32.xlu1 %v185_v11, %s761_s4 }
  0x5c   : > { %325 = vperm.xlu0 %643, %v322_v14  }
  0xae   : > { %v214_v15 = vpop.permute.xlu1 %213  ;;  %v201_v16 = vpop.permute.xlu0 %200 }
  0xaf   : > { %v203_v17 = vrot.slane %v201_v16, 4  ;;  %v217_v25 = vrot.slane %v214_v15, 4 }
  0xb1   : > { %v208_v18 = vsel %vm206_vm1, %v201_v16, %v203_v17 }
  0xb2   : > { %212 = vst [vmem:[#allocation2 + $0x8] sm:$0xc] %v208_v18  ;;  %v230_v19 = vpop.permute.xlu1 %229  ;;  %v242_v20 = vpop.permute.xlu0 %241 }
  0xb3   : > { %v232_v21 = vrot.slane %v230_v19, 4  ;;  %v245_v35 = vrot.slane %v242_v20, 4 }
  0xb5   : > { %v236_v22 = vsel %vm234_vm2, %v230_v19, %v232_v21  ;;  %v311_v19 = vld [vmem:[%s942_s1] sm:$0xf] }
  0xb6   : > { %240 = vst [vmem:[#allocation2 + $0x14] sm:$0xc] %v236_v22  ;;  %v199_v23 = vpop.permute.xlu0 %198  ;;  %v216_v24 = vpop.permute.xlu1 %215 }
  0xb7   : > { %v202_v26 = vrot.slane %v199_v23, 4  ;;  %v218_v27 = vrot.slane %v216_v24, 4 }
  0xb9   : > { %v205_v28 = vsel %vm204_vm3, %v202_v26, %v203_v17  ;;  %v219_v29 = vsel %vm204_vm3, %v217_v25, %v218_v27  ;;  %v222_v30 = vsel %vm220_vm4, %v216_v24, %v218_v27 }
  0xba   : > { %v207_v31 = vsel %vm206_vm1, %v199_v23, %v205_v28  ;;  %v221_v32 = vsel %vm220_vm4, %v214_v15, %v219_v29  ;;  %226 = vst [vmem:[#allocation2 + $0x14] sm:$0x3] %v222_v30  ;;  %v228_v33 = vpop.permute.xlu0 %227  ;;  %v244_v34 = vpop.permute.xlu1 %243 }
  0xbb   : > { %211 = vst [vmem:[#allocation2] sm:$0xcc] %v207_v31  ;;  %225 = vst [vmem:[#allocation2 + $0xc] sm:$0x33] %v221_v32  ;;  %v231_v36 = vrot.slane %v228_v33, 4  ;;  %v246_v37 = vrot.slane %v244_v34, 4 }
  0xbd   : > { %v233_v38 = vsel %vm204_vm3, %v231_v36, %v232_v21  ;;  %v247_v39 = vsel %vm204_vm3, %v245_v35, %v246_v37  ;;  %v250_v40 = vsel %vm248_vm5, %v244_v34, %v246_v37 }
  0xbe   : > { %v235_v41 = vsel %vm234_vm2, %v228_v33, %v233_v38  ;;  %v249_v42 = vsel %vm248_vm5, %v242_v20, %v247_v39  ;;  %254 = vst [vmem:[#allocation2 + $0x20] sm:$0x3] %v250_v40  ;;  %v256_v43 = vpop.permute.xlu0 %255  ;;  %v258_v44 = vpop.permute.xlu1 %257 }
  0xbf   : > { %239 = vst [vmem:[#allocation2 + $0xc] sm:$0xcc] %v235_v41  ;;  %253 = vst [vmem:[#allocation2 + $0x18] sm:$0x33] %v249_v42  ;;  %v259_v45 = vrot.slane %v256_v43, 4  ;;  %v260_v46 = vrot.slane %v258_v44, 4 }
  0xc1   : > { %v261_v47 = vsel %vm204_vm3, %v259_v45, %v260_v46  ;;  %v264_v48 = vsel %vm262_vm6, %v258_v44, %v260_v46  ;;  %v644_v49 = vld [vmem:[#allocation2 + $0x8] ss:$12 sps:$4 sm:$0xff]  }
  0xc2   : > { %v263_v50 = vsel %vm262_vm6, %v256_v43, %v261_v47  ;;  %268 = vst [vmem:[#allocation2 + $0x20] sm:$0xc] %v264_v48  ;;  %v270_v51 = vpop.permute.xlu0 %269  ;;  %v272_v52 = vpop.permute.xlu1 %271  ;;  %571 = vmatpush3.bf16.msra.mxu1 %v644_v49 }
  0xc3   : > { %267 = vst [vmem:[#allocation2 + $0x18] sm:$0xcc] %v263_v50  ;;  %v273_v53 = vrot.slane %v270_v51, 4  ;;  %v274_v54 = vrot.slane %v272_v52, 4  ;;  %572 = vmatprep.subr.bf16.mxu1 %v757_v12 }
  0xc5   : > { %v275_v55 = vsel %vm204_vm3, %v273_v53, %v274_v54  ;;  %v278_v56 = vsel %vm276_vm7, %v272_v52, %v274_v54 }
  0xc6   : > { %v277_v57 = vsel %vm276_vm7, %v270_v51, %v275_v55  ;;  %282 = vst [vmem:[#allocation2 + $0x2c] sm:$0x3] %v278_v56  ;;  %v284_v58 = vpop.permute.xlu0 %283  ;;  %v286_v59 = vpop.permute.xlu1 %285  ;;  %v645_v60 = vld [vmem:[#allocation2 + $0x4] ss:$12 sps:$4 sm:$0xff]   ;;  %v647_v61 = vld [vmem:[#allocation2] ss:$12 sps:$4 sm:$0xff]  }
  0xc7   : > { %281 = vst [vmem:[#allocation2 + $0x24] sm:$0x33] %v277_v57  ;;  %v287_v62 = vrot.slane %v284_v58, 4  ;;  %v288_v63 = vrot.slane %v286_v59, 4  ;;  %382 = vmatprep.subr.bf16.mxu0 %v645_v60 }
  0xc8   : > { %383 = vmatpush1.bf16.msra.mxu0 %v647_v61 }
  0xc9   : > { %v289_v0 = vsel %vm204_vm3, %v287_v62, %v288_v63  ;;  %v292_v1 = vsel %vm290_vm8, %v286_v59, %v288_v63 }
  0xca   : > { %v291_v2 = vsel %vm290_vm8, %v284_v58, %v289_v0  ;;  %296 = vst [vmem:[#allocation2 + $0x2c] sm:$0xc] %v292_v1  ;;  %v298_v3 = vpop.permute.xlu0 %297  ;;  %v300_v4 = vpop.permute.xlu1 %299 }
  0xcb   : > { %295 = vst [vmem:[#allocation2 + $0x24] sm:$0xcc] %v291_v2  ;;  %v301_v5 = vrot.slane %v298_v3, 4  ;;  %v302_v6 = vrot.slane %v300_v4, 4 }
  0xcd   : > { %v303_v7 = vsel %vm204_vm3, %v301_v5, %v302_v6  ;;  %v306_v8 = vsel %vm304_vm9, %v300_v4, %v302_v6 }
  0xce   : > { %v305_v9 = vsel %vm304_vm9, %v298_v3, %v303_v7  ;;  %310 = vst [vmem:[#allocation2 + $0x38] sm:$0x3] %v306_v8 }
  0xcf   : > { %309 = vst [vmem:[#allocation2 + $0x30] sm:$0x33] %v305_v9 }
  0xd1   : > { %v648_v10 = vld [vmem:[#allocation2 + $0x20] ss:$12 sps:$4 sm:$0xff]  }
  0xd2   : > { %v649_v11 = vld [vmem:[#allocation2 + $0x1c] ss:$12 sps:$4 sm:$0xff]   ;;  %v651_v13 = vld [vmem:[#allocation2 + $0x18] ss:$12 sps:$4 sm:$0xff]   ;;  %573 = vmatpush3.bf16.msra.mxu1 %v648_v10 }
  0xd3   : > { %384 = vmatprep.subr.bf16.mxu0 %v649_v11  ;;  %574 = vmatprep.subr.bf16.mxu1 %v757_v12 }
  0xd4   : > { %385 = vmatpush1.bf16.msra.mxu0 %v651_v13 }
  0xd5   : > { %v653_v14 = vld [vmem:[#allocation2 + $0x38] ss:$0 sps:$4 sm:$0x33]  }
  0xd6   : > { %v320_v15 = vld [vmem:[#allocation2 + $0x30] sm:$0x33]  ;;  %v380_v17 = vsel %vm372_vm10, %v653_v14, 0 }
  0xd7   : > { %v557_v16 = vcombine.high %v320_v15, %v320_v15  ;;  %v556_v18 = vcombine.low %v320_v15, %v320_v15  ;;  %575 = vmatpush3.bf16.msra.mxu1 %v380_v17 }
  0xd9   : > { %559 = vmatprep.subr.msk.bf16.mxu0 %vm372_vm10, %v557_v16  ;;  %v374_v20 = vsel %vm372_vm10, %v556_v18, 0 }
  0xda   : > { %387 = vmatpush1.bf16.msra.mxu0 %v374_v20  ;;  %577 = vmatmul.mubr.msk.bf16.vlgmr.msra.gmra.mrb[0].mxu1 %vm368_vm11, %v311_v19 }
  0xdb   : > { %v326_v12 = vpop.permute.xlu0 %325 }
  0xdd   : > { %560 = vmatmul.mubr.msk.bf16.vlgmr.msra.gmra.mrb[0].mxu0 %vm368_vm11, %v311_v19 }
 0x1ad   : > { %v457_v21 = vpop.f32.mrb[0].mxu1 }
 0x1ae   : > { %v458_v22 = vadd.f32 %v457_v21, %v326_v12  ;;  %v578_v23 = vpop.f32.mrb[1].mxu1 }
 0x1af   : > { %v460_v25 = vpop.f32.mrb[2].mxu1 }
 0x1b0   : > { %v416_v24 = vpop.f32.mrb[0].mxu0  ;;  %465 = vst [vmem:[%s161_s17 + $0x10] sm:$0xff] %v458_v22  ;;  %v579_v28 = vpop.f32.mrb[3].mxu1 }
 0x1b1   : > { %v417_v26 = vadd.f32 %v416_v24, %v326_v12  ;;  %v418_v27 = vpop.f32.mrb[1].mxu0 }
 0x1b2   : > { %v419_v29 = vadd.f32 %v418_v27, %v326_v12  ;;  %v420_v30 = vpop.f32.mrb[2].mxu0 }
 0x1b3   : > { %463 = vst [vmem:[%s161_s17] sm:$0xff] %v417_v26  ;;  %v421_v31 = vpop.f32.mrb[3].mxu0 }
 0x1b4   : > { %464 = vst [vmem:[%s161_s17 + $0x8] sm:$0xff] %v419_v29 }
 0x1b5   : > { %696 = shalt.err (!%p693_p4)
}
 0x1b6   : > { %s697_s11 = scalar_lea.hbm %s899_s25, 384  ;;  %s701_s5 = scalar_lea.hbm %s944_s3, 768 }
 0x1b7   : > { %p698_p7 = scmp.ne.s32.totalorder %s899_s25, %s697_s11  ;;  %p702_p13 = scmp.lt.u32.totalorder %s899_s25, %s944_s3 }
 0x1b8   : > { %p703_p1 = scmp.lt.u32.totalorder %s701_s5, %s697_s11  ;;  %p705_p5 = scmp.lt.u32.totalorder %s697_s11, %s899_s25 }
 0x1b9   : > { %p699_p8 = pnand %p698_p7, %p955_p6 }
 0x1ba   : > { %p704_p0 = por %p703_p1, %p702_p13 }
 0x1bb   : > { %p700_p11 = pneg %p699_p8 }
 0x1bc   : > { %p706_p9 = por %p705_p5, %p704_p0 }
 0x1be   : > { %p707_p10 = pnand %p706_p9, %p700_p11 }
 0x1c0   : > { %710 = shalt.err (!%p707_p10)
}
 0x1c1   : > { %585 = dma.vmem_to_hbm [thread:$0]  (%p955_p6), %s901_s19, 384, %s899_s25, %s467_s26  }
 0x1c2 PF: > { %p597_p12 = scmp.ge.s32.totalorder %s749_s15, 2  ;;  %s493_s8 = sand.u32 1, %s737_s12  }
 0x1c3   : > { %p956_p2 = scmp.ne.s32.totalorder %s949_s23, 0  ;;  %s494_s9 = scalar_lea.sflag [#allocation5], %s493_s8 }
 0x1c5   : > { %p592_p3 = pnand %p597_p12, %p956_p2 }
 0x1c7   : > { %732 = dma.done.wait (!%p592_p3), %s494_s9, 384  }
 0x1c8   : > { %734 = vsyncadd (!%p592_p3), %s494_s9, 4294966912  ;;  %p14_p4 = scmp.ge.s32.totalorder %s810_s18, 4   ;;  %s957_s12 = smov %s741_s13 }
 0x1c9   : > { %s958_s13 = smov %s745_s14  ;;  %s959_s14 = smov %s821_s21 }
 0x1ca   : > { %s960_s15 = smov %s810_s18  ;;  %16 = sbr.rel (!%p14_p4) target bundleno = 4 (0x4), region = 70 }
 0x1d1   :  { %499 = vsyncpa [#allocation4], 1 }
 0x1d2   :  { %501 = vsyncpa [#allocation4 + $0x1], 1 }
 0x1d3   :  { %502 = vsyncpa [#allocation5], 1 }
 0x1d4   :  { %504 = vsyncpa [#allocation5 + $0x1], 1 }

</bundles_post_ra>
